<compile_context>
chip_gen: v6e
topology: v6e:2x2x1
jax: 0.10.0
libtpu: 0.0.40
codegen_flags: <defaults>
</compile_context>

<pallas_src>
import functools
import math

import jax
import jax.numpy as jnp
from jax import lax
from jax.experimental import pallas as pl
from jax.experimental.pallas import tpu as pltpu


def _round_up(x, m):
    return ((x + m - 1) // m) * m


def _vmem_budget_bytes():
    """Generation-aware per-TensorCore VMEM budget for tile sizing."""
    try:
        kind = jax.devices()[0].device_kind.lower()
    except Exception:
        kind = ""
    if "v5" in kind or "v6" in kind:
        return 96 * 1024 * 1024      # 128 MiB physical VMEM
    if "v7" in kind or "7x" in kind:
        return 48 * 1024 * 1024      # 64 MiB physical per TensorCore
    return 32 * 1024 * 1024          # conservative default (unknown gen)


def _sigmoid_f32(x, *, approx):
    if approx:
        # exp on the EUP + approximate reciprocal on the EUP: keeps the whole
        # sigmoid off the VPU / vst critical path.
        return pl.reciprocal(1.0 + jnp.exp(-x), approx=True)
    return jax.nn.sigmoid(x)


# ----------------------------------------------------------------------------
# forward: per-edge inner product decoder
# ----------------------------------------------------------------------------
def _edge_tile_for(D, budget):
    # target ~budget/4 bytes of double-buffered gathered operands per step
    per_edge = 2 * D * 4                           # src + dst rows, f32
    te = (budget // 4) // max(2 * per_edge, 1)     # 2x = double buffering
    return int(min(32768, max(2048, _round_up(te, 128))))


def _edge_decode_fused_kernel(z_ref, ei_ref, out_ref, *, sigmoid):
    # z_ref : (N, D) resident latent matrix (constant block index)
    # ei_ref: (2, TE) int32 edge tile;  out_ref: (TE//128, 128) lane-dense
    zv = z_ref[...]
    idx = ei_ref[...]
    # mode="clip" is the explicit bounds guard (no runtime OOB check on VMEM).
    zs = jnp.take(zv, idx[0], axis=0, mode="clip")     # (TE, D)
    zd = jnp.take(zv, idx[1], axis=0, mode="clip")     # (TE, D)
    val = jnp.sum(zs * zd, axis=-1)                    # (TE,)
    if sigmoid:
        val = _sigmoid_f32(val, approx=False)
    out_ref[...] = val.reshape(out_ref.shape)


def _forward_fused(z, edge_index, sigmoid, te, vmem_limit):
    N, D = z.shape
    E = edge_index.shape[1]
    Ep = _round_up(max(E, 1), te)
    ei = jnp.pad(edge_index.astype(jnp.int32), ((0, 0), (0, Ep - E)))
    R = te // 128

    kernel = functools.partial(_edge_decode_fused_kernel, sigmoid=sigmoid)
    out2d = pl.pallas_call(
        kernel,
        out_shape=jax.ShapeDtypeStruct((Ep // 128, 128), jnp.float32),
        grid_spec=pltpu.PrefetchScalarGridSpec(
            num_scalar_prefetch=0,
            grid=(Ep // te,),
            in_specs=[
                pl.BlockSpec((N, D), lambda i: (0, 0)),    # z resident in VMEM
                pl.BlockSpec((2, te), lambda i: (0, i)),   # streamed edge tile
            ],
            out_specs=pl.BlockSpec((R, 128), lambda i: (i, 0)),
        ),
        compiler_params=pltpu.CompilerParams(
            dimension_semantics=("parallel",),
            vmem_limit_bytes=vmem_limit),
    )(z.astype(jnp.float32), ei)
    out = out2d.reshape(Ep)[:E]
    # block here so any Mosaic compile/runtime rejection surfaces inside the
    # caller's try/except and we can fall back cleanly.
    return jax.block_until_ready(out)


def _edge_decode_kernel(zs_ref, zd_ref, out_ref, *, sigmoid):
    # zs_ref, zd_ref: (R, 128, D) gathered rows; out_ref: (R, 128) lane-dense
    prod = zs_ref[...] * zd_ref[...]            # VPU elementwise
    val = jnp.sum(prod, axis=-1)                # lane reduce -> (R, 128)
    if sigmoid:
        val = _sigmoid_f32(val, approx=False)
    out_ref[...] = val                          # lane-dense store


def _forward_gathered(z, edge_index, sigmoid, te, vmem_limit):
    # TODO(synk): Mosaic cannot lower an arbitrary-length row gather on every
    # backend; when the fused kernel is rejected the gather stays in XLA and
    # only the HBM-bound multiply/reduce/sigmoid runs in Pallas.
    z_src = jnp.take(z, edge_index[0], axis=0)   # [E, D]
    z_dst = jnp.take(z, edge_index[1], axis=0)   # [E, D]
    E, D = z_src.shape

    te = min(te, _round_up(max(E, 1), 128))
    Ep = _round_up(E, te)
    if Ep != E:
        pad = ((0, Ep - E), (0, 0))
        z_src = jnp.pad(z_src, pad)
        z_dst = jnp.pad(z_dst, pad)

    R = te // 128
    # Contiguous (free) reshapes: edges as (row-group, 128, D) so the output
    # block is a lane-dense (R, 128) slab (no masked partial stores).
    z_src = z_src.reshape(Ep // 128, 128, D)
    z_dst = z_dst.reshape(Ep // 128, 128, D)

    kernel = functools.partial(_edge_decode_kernel, sigmoid=sigmoid)
    out2d = pl.pallas_call(
        kernel,
        out_shape=jax.ShapeDtypeStruct((Ep // 128, 128), jnp.float32),
        grid_spec=pltpu.PrefetchScalarGridSpec(
            num_scalar_prefetch=0,
            grid=(Ep // te,),
            in_specs=[
                pl.BlockSpec((R, 128, D), lambda i: (i, 0, 0)),
                pl.BlockSpec((R, 128, D), lambda i: (i, 0, 0)),
            ],
            out_specs=pl.BlockSpec((R, 128), lambda i: (i, 0)),
        ),
        compiler_params=pltpu.CompilerParams(
            dimension_semantics=("parallel",),
            vmem_limit_bytes=vmem_limit),
    )(z_src, z_dst)
    return out2d.reshape(Ep)[:E]


def inner_product_forward(z, edge_index, sigmoid=True, *, edge_tile=None,
                          fuse_gather=True):
    """value = sigmoid((z[edge_index[0]] * z[edge_index[1]]).sum(dim=1))"""
    N, D = z.shape
    E = edge_index.shape[1]
    budget = _vmem_budget_bytes()

    te = edge_tile if edge_tile is not None else _edge_tile_for(D, budget)
    te = _round_up(te, 128)
    te = min(te, _round_up(max(E, 1), 128))

    if fuse_gather:
        te_f = min(te, 8192)   # cap in-kernel gather intermediates
        # resident z (double-buffered) + index tiles + gathered temporaries
        fused_bytes = 2 * N * D * 4 + 2 * 2 * te_f * 4 + 3 * te_f * D * 4
        if fused_bytes <= int(0.6 * budget):
            try:
                return _forward_fused(z, edge_index, sigmoid, te_f, budget)
            except Exception:
                # Mosaic rejected the in-kernel gather on this backend;
                # fall back to the XLA-gather + Pallas reduce path.
                pass
    return _forward_gathered(z, edge_index, sigmoid, te, budget)


# ----------------------------------------------------------------------------
# forward_all: dense adjacency = sigmoid((z @ w) @ z.T)
# ----------------------------------------------------------------------------
def _zw_kernel(z_ref, w_ref, out_ref):
    # (TM, D) @ (D, D) -> (TM, D); w block index is constant so it is DMA'd
    # once, and this product is NOT redone per (i, j) output tile.
    out_ref[...] = jnp.dot(z_ref[...], w_ref[...],
                           preferred_element_type=jnp.float32
                           ).astype(out_ref.dtype)


def _adj_kernel(zw_ref, zc_ref, out_ref, *, sigmoid, approx):
    # (TM, D) x (TN, D) contracted over D -> (TM, TN); z.T never materialised.
    acc = lax.dot_general(zw_ref[...], zc_ref[...],
                          dimension_numbers=(((1,), (1,)), ((), ())),
                          preferred_element_type=jnp.float32)
    if sigmoid:
        acc = _sigmoid_f32(acc, approx=approx)
    out_ref[...] = acc.astype(out_ref.dtype)


def inner_product_forward_all(z, w, sigmoid=True, *, out_dtype=jnp.float32,
                              matmul_dtype=jnp.bfloat16, approx_sigmoid=None,
                              row_tile=None, col_tile=None):
    """adj = sigmoid((z @ w) @ z.T), tiled over the (N, N) output.

    matmul_dtype=bf16 (default) keeps the MXU on its native path with f32
    accumulation; pass matmul_dtype=jnp.float32 for bit-accurate f32.
    out_dtype=bf16 halves the dominant N^2 HBM store.
    """
    N, D = z.shape
    budget = _vmem_budget_bytes()
    if approx_sigmoid is None:
        approx_sigmoid = (matmul_dtype != jnp.float32)
    out_it = jnp.dtype(out_dtype).itemsize
    in_it = jnp.dtype(matmul_dtype).itemsize

    # ---- stage-2 tiles, sized against the per-TC VMEM budget ----
    TM = row_tile if row_tile is not None else 1024
    TN = col_tile if col_tile is not None else \
        (4096 if budget >= 64 * 1024 * 1024 else 2048)
    TM = min(TM, _round_up(N, 8))
    TN = min(TN, _round_up(N, 128))

    def _stage2_bytes(tm, tn):
        # double-buffered output tile + double-buffered zw / z-column tiles
        return 2 * tm * tn * out_it + 2 * (tm + tn) * D * in_it

    if col_tile is None:
        while _stage2_bytes(TM, TN) > int(0.75 * budget) and TN > 512:
            TN //= 2
    if row_tile is None:
        while _stage2_bytes(TM, TN) > int(0.75 * budget) and TM > 128:
            TM //= 2

    Nr = _round_up(N, TM)
    Nc = _round_up(N, TN)
    z_rows = (jnp.pad(z, ((0, Nr - N), (0, 0))) if Nr != N else z
              ).astype(matmul_dtype)
    z_cols = (jnp.pad(z, ((0, Nc - N), (0, 0))) if Nc != N else z
              ).astype(matmul_dtype)
    w_c = w.astype(matmul_dtype)

    # ---- stage 1: zw = z @ w (hoisted out of the (i, j) output grid) ----
    # TODO(synk): fold stage 1 into stage 2 (compute the zw row tile into a
    # VMEM scratch at j == 0 with pl.when, keeping the j axis "arbitrary") to
    # drop the zw HBM round trip; only a few-% win, kept separate for clarity.
    zw = pl.pallas_call(
        _zw_kernel,
        out_shape=jax.ShapeDtypeStruct((Nr, D), matmul_dtype),
        grid_spec=pltpu.PrefetchScalarGridSpec(
            num_scalar_prefetch=0,
            grid=(Nr // TM,),
            in_specs=[
                pl.BlockSpec((TM, D), lambda i: (i, 0)),
                # Constant block index: w is DMA'd once but still silently
                # double-buffered.  TODO(synk): pipeline_mode=pl.Buffered(1)
                # here (and on the stage-2 zw spec) if large-D VMEM pressure
                # shows up in profiles.
                pl.BlockSpec((D, D), lambda i: (0, 0)),
            ],
            out_specs=pl.BlockSpec((TM, D), lambda i: (i, 0)),
        ),
        compiler_params=pltpu.CompilerParams(
            dimension_semantics=("parallel",),
            vmem_limit_bytes=budget),
    )(z_rows, w_c)

    # ---- stage 2: adj = sigmoid(zw @ z.T), tiled (i, j) over the output ----
    kernel = functools.partial(_adj_kernel, sigmoid=sigmoid,
                               approx=approx_sigmoid)
    adj = pl.pallas_call(
        kernel,
        out_shape=jax.ShapeDtypeStruct((Nr, Nc), out_dtype),
        grid_spec=pltpu.PrefetchScalarGridSpec(
            num_scalar_prefetch=0,
            grid=(Nr // TM, Nc // TN),
            in_specs=[
                pl.BlockSpec((TM, D), lambda i, j: (i, 0)),   # zw row tile
                pl.BlockSpec((TN, D), lambda i, j: (j, 0)),   # z column tile
            ],
            out_specs=pl.BlockSpec((TM, TN), lambda i, j: (i, j)),
        ),
        compiler_params=pltpu.CompilerParams(
            dimension_semantics=("parallel", "parallel"),
            vmem_limit_bytes=budget),
    )(zw, z_cols)
    return adj[:N, :N]


# ----------------------------------------------------------------------------
# deterministic parameter init (glorot uniform, as in the PyTorch module)
# ----------------------------------------------------------------------------
def init_w(key, in_channels, out_channels):
    stdv = math.sqrt(6.0 / (in_channels + out_channels))
    return jax.random.uniform(
        key, (in_channels, out_channels),
        minval=-stdv, maxval=stdv, dtype=jnp.float32)


if __name__ == "__main__":
    key = jax.random.PRNGKey(0)
    k_z, k_e0, k_e1, k_w = jax.random.split(key, 4)

    N, D, E = 16, 32, 8          # nodes, latent dim (in=out channels), edges
    z = jax.random.normal(k_z, (N, D), dtype=jnp.float32)
    edge_index = jnp.stack([
        jax.random.randint(k_e0, (E,), 0, N, dtype=jnp.int32),
        jax.random.randint(k_e1, (E,), 0, N, dtype=jnp.int32),
    ], axis=0)                    # [2, E]
    w = init_w(k_w, D, D)

    # --- Pallas kernels ---
    val = inner_product_forward(z, edge_index, sigmoid=True)
    adj_exact = inner_product_forward_all(z, w, sigmoid=True,
                                          matmul_dtype=jnp.float32)
    adj = inner_product_forward_all(z, w, sigmoid=True)          # bf16 MXU path
    adj_bf16 = inner_product_forward_all(z, w, sigmoid=True,
                                         out_dtype=jnp.bfloat16)
    jax.block_until_ready((val, adj_exact, adj, adj_bf16))

    # --- pure-JAX references ---
    ref_val = jax.nn.sigmoid(
        jnp.sum(z[edge_index[0]] * z[edge_index[1]], axis=1))
    ref_adj = jax.nn.sigmoid((z @ w) @ z.T)

    assert val.shape == (E,) and val.dtype == jnp.float32
    assert adj_exact.shape == (N, N) and adj_exact.dtype == jnp.float32
    assert adj.shape == (N, N) and adj.dtype == jnp.float32
    assert adj_bf16.shape == (N, N) and adj_bf16.dtype == jnp.bfloat16
    assert jnp.allclose(val, ref_val, atol=1e-5, rtol=1e-5)
    assert jnp.allclose(adj_exact, ref_adj, atol=1e-5, rtol=1e-5)
    assert jnp.allclose(adj, ref_adj, atol=2e-2, rtol=2e-2)
    assert jnp.allclose(adj_bf16.astype(jnp.float32), ref_adj,
                        atol=3e-2, rtol=3e-2)

    print("KERNEL_OK")
</pallas_src>

<mosaic_0001>
module attributes {stable_mosaic.version = 11 : i64} {
  func.func @_edge_decode_kernel(%arg0: i32, %arg1: memref<1x128x32xf32, #tpu.memory_space<vmem>>, %arg2: memref<1x128x32xf32, #tpu.memory_space<vmem>>, %arg3: memref<1x128xf32, #tpu.memory_space<vmem>>) attributes {dimension_semantics = [#tpu.dimension_semantics<parallel>], iteration_bounds = array<i64: 1>, scalar_prefetch = 0 : i64, scratch_operands = 0 : i64, tpu.core_type = #tpu.core_type<tc>, window_params = [{transform_indices = @transform_0, window_bounds = array<i64: 1, 128, 32>}, {transform_indices = @transform_1, window_bounds = array<i64: 1, 128, 32>}, {transform_indices = @transform_2, window_bounds = array<i64: 1, 128>}]} {
    %c0 = arith.constant 0 : index
    %c0_0 = arith.constant 0 : index
    %c0_1 = arith.constant 0 : index
    %0 = vector.load %arg1[%c0, %c0_0, %c0_1] : memref<1x128x32xf32, #tpu.memory_space<vmem>>, vector<1x128x32xf32>
    %c0_2 = arith.constant 0 : index
    %c0_3 = arith.constant 0 : index
    %c0_4 = arith.constant 0 : index
    %1 = vector.load %arg2[%c0_2, %c0_3, %c0_4] : memref<1x128x32xf32, #tpu.memory_space<vmem>>, vector<1x128x32xf32>
    %2 = arith.mulf %0, %1 : vector<1x128x32xf32>
    %cst = arith.constant dense<0.000000e+00> : vector<1x128xf32>
    %3 = vector.multi_reduction <add>, %2, %cst [2] : vector<1x128x32xf32> to vector<1x128xf32>
    %4 = arith.negf %3 : vector<1x128xf32>
    %5 = math.exp %4 : vector<1x128xf32>
    %cst_5 = arith.constant 1.000000e+00 : f32
    %6 = vector.broadcast %cst_5 : f32 to vector<1x128xf32>
    %7 = arith.addf %6, %5 : vector<1x128xf32>
    %8 = arith.divf %6, %7 : vector<1x128xf32>
    %c0_6 = arith.constant 0 : index
    %c0_7 = arith.constant 0 : index
    %9 = vector.load %arg3[%c0_6, %c0_7] : memref<1x128xf32, #tpu.memory_space<vmem>>, vector<1x128xf32>
    tpu.vector_store %arg3[%c0_6, %c0_7], %8 {strides = array<i32>} : memref<1x128xf32, #tpu.memory_space<vmem>>, vector<1x128xf32>,
    return
  }
  func.func @transform_0(%arg0: i32) -> (i32, i32, i32) {
    %c0_i32 = arith.constant 0 : i32
    %c0_i32_0 = arith.constant 0 : i32
    %c0_i32_1 = arith.constant 0 : i32
    return %arg0, %c0_i32, %c0_i32_0 : i32, i32, i32
  }
  func.func @transform_1(%arg0: i32) -> (i32, i32, i32) {
    %c0_i32 = arith.constant 0 : i32
    %c0_i32_0 = arith.constant 0 : i32
    %c0_i32_1 = arith.constant 0 : i32
    return %arg0, %c0_i32, %c0_i32_0 : i32, i32, i32
  }
  func.func @transform_2(%arg0: i32) -> (i32, i32) {
    %c0_i32 = arith.constant 0 : i32
    %c0_i32_0 = arith.constant 0 : i32
    return %arg0, %c0_i32 : i32, i32
  }
}

</mosaic_0001>

<bundles_post_ra>
// kernel: tpu_custom_call.1
= control target key start
LH: loop header
LB: loop body
LE: loop exit
PB: predicated region body
PF: predicated region fallthrough
CT: control target
= control target key end

     0   :  { %vm60_vm0 = vcmask 261120   ;;  %s620_s0 = inlined_call_operand.vmem [shape: f32[1,128,32], index: 0, kind: input, shape index: {}]   ;;  %s621_s1 = inlined_call_operand.vmem [shape: f32[1,128,32], index: 1, kind: input, shape index: {}]   ;;  %s622_s2 = inlined_call_operand.hbm [shape: f32[1,128], index: 2, kind: output, shape index: {}]  }
   0x1   :  { %v12_v0 = vld [vmem:[%s620_s0] sm:$0xff]  ;;  %v14_v2 = vld [vmem:[%s620_s0 + $0x10] sm:$0xff]  ;;  %v13_v5 = vld [vmem:[%s620_s0 + $0x8] sm:$0xff] }
   0x2   :  { %v28_v1 = vld [vmem:[%s621_s1] sm:$0xff]  ;;  %v30_v4 = vld [vmem:[%s621_s1 + $0x10] sm:$0xff]  ;;  %v29_v6 = vld [vmem:[%s621_s1 + $0x8] sm:$0xff] }
   0x3   :  { %v44_v3 = vmul.f32 %v28_v1, %v12_v0  ;;  %v46_v7 = vmul.f32 %v30_v4, %v14_v2  ;;  %v45_v8 = vmul.f32 %v29_v6, %v13_v5  ;;  %v15_v9 = vld [vmem:[%s620_s0 + $0x18] sm:$0xff]  ;;  %v16_v11 = vld [vmem:[%s620_s0 + $0x20] sm:$0xff]  ;;  %v17_v15 = vld [vmem:[%s620_s0 + $0x28] sm:$0xff] }
   0x4   :  { %v31_v10 = vld [vmem:[%s621_s1 + $0x18] sm:$0xff]  ;;  %v32_v14 = vld [vmem:[%s621_s1 + $0x20] sm:$0xff]  ;;  %v33_v16 = vld [vmem:[%s621_s1 + $0x28] sm:$0xff] }
   0x5   :  { %v61_v12 = vsel %vm60_vm0, %v44_v3, 0.0  ;;  %v47_v13 = vmul.f32 %v31_v10, %v15_v9  ;;  %v67_v17 = vsel %vm60_vm0, %v46_v7, 0.0  ;;  %v64_v18 = vsel %vm60_vm0, %v45_v8, 0.0  ;;  %v18_v22 = vld [vmem:[%s620_s0 + $0x30] sm:$0xff]  ;;  %v19_v24 = vld [vmem:[%s620_s0 + $0x38] sm:$0xff]  ;;  %v20_v30 = vld [vmem:[%s620_s0 + $0x40] sm:$0xff] }
   0x6   :  { %62 = vadd.xlane.f32.xlu0 %v61_v12  ;;  %68 = vadd.xlane.f32.xlu1 %v67_v17  ;;  %v48_v19 = vmul.f32 %v32_v14, %v16_v11  ;;  %v49_v21 = vmul.f32 %v33_v16, %v17_v15  ;;  %v34_v23 = vld [vmem:[%s621_s1 + $0x30] sm:$0xff]  ;;  %v35_v25 = vld [vmem:[%s621_s1 + $0x38] sm:$0xff]  ;;  %v36_v31 = vld [vmem:[%s621_s1 + $0x40] sm:$0xff] }
   0x7   :  { %v70_v20 = vsel %vm60_vm0, %v47_v13, 0.0  ;;  %v50_v27 = vmul.f32 %v34_v23, %v18_v22  ;;  %v51_v29 = vmul.f32 %v35_v25, %v19_v24 }
   0x8   :  { %v73_v26 = vsel %vm60_vm0, %v48_v19, 0.0  ;;  %v76_v28 = vsel %vm60_vm0, %v49_v21, 0.0 }
   0xa   :  { %65 = vadd.xlane.f32.xlu0 %v64_v18  ;;  %71 = vadd.xlane.f32.xlu1 %v70_v20 }
   0xb   :  { %7 = vsyncpa [#allocation3], 0  ;;  %v21_v32 = vld [vmem:[%s620_s0 + $0x48] sm:$0xff]  ;;  %v79_v34 = vsel %vm60_vm0, %v50_v27, 0.0  ;;  %v52_v35 = vmul.f32 %v36_v31, %v20_v30  ;;  %v82_v36 = vsel %vm60_vm0, %v51_v29, 0.0  ;;  %v22_v38 = vld [vmem:[%s620_s0 + $0x50] sm:$0xff]  ;;  %v221_v25 = vlaneseq }
   0xc   :  { %v37_v33 = vld [vmem:[%s621_s1 + $0x48] sm:$0xff]  ;;  %v38_v39 = vld [vmem:[%s621_s1 + $0x50] sm:$0xff]  ;;  %v23_v40 = vld [vmem:[%s620_s0 + $0x58] sm:$0xff]  ;;  %vm232_vm1 = vcmask 130112   ;;  %vm239_vm2 = vcmask 195712   ;;  %vm246_vm3 = vcmask 261312  }
   0xd   :  { %v53_v37 = vmul.f32 %v37_v33, %v21_v32  ;;  %v39_v41 = vld [vmem:[%s621_s1 + $0x58] sm:$0xff]  ;;  %v85_v42 = vsel %vm60_vm0, %v52_v35, 0.0  ;;  %v54_v43 = vmul.f32 %v38_v39, %v22_v38  ;;  %v24_v46 = vld [vmem:[%s620_s0 + $0x60] sm:$0xff]  ;;  %v25_v48 = vld [vmem:[%s620_s0 + $0x68] sm:$0xff]  ;;  %vm253_vm4 = vcmask 326912  }
   0xe   :  { %74 = vadd.xlane.f32.xlu0 %v73_v26  ;;  %77 = vadd.xlane.f32.xlu1 %v76_v28  ;;  %v55_v45 = vmul.f32 %v39_v41, %v23_v40  ;;  %v40_v47 = vld [vmem:[%s621_s1 + $0x60] sm:$0xff]  ;;  %v41_v49 = vld [vmem:[%s621_s1 + $0x68] sm:$0xff]  ;;  %v26_v54 = vld [vmem:[%s620_s0 + $0x70] sm:$0xff]  ;;  %vm260_vm5 = vcmask 392512   ;;  %vm267_vm6 = vcmask 458112   ;;  %vm274_vm7 = vcmask 523712  }
   0xf   :  { %v88_v44 = vsel %vm60_vm0, %v53_v37, 0.0  ;;  %v91_v50 = vsel %vm60_vm0, %v54_v43, 0.0  ;;  %v56_v51 = vmul.f32 %v40_v47, %v24_v46  ;;  %v57_v53 = vmul.f32 %v41_v49, %v25_v48  ;;  %v42_v55 = vld [vmem:[%s621_s1 + $0x70] sm:$0xff]  ;;  %v27_v56 = vld [vmem:[%s620_s0 + $0x78] sm:$0xff]  ;;  %s451_s0 = smov [#allocation2]  }
  0x10   :  { %v94_v52 = vsel %vm60_vm0, %v55_v45, 0.0  ;;  %v43_v57 = vld [vmem:[%s621_s1 + $0x78] sm:$0xff]  ;;  %v58_v59 = vmul.f32 %v42_v55, %v26_v54  ;;  %v581_v43 = vshrl.u32 %v221_v25, 7  ;;  %vm281_vm8 = vcmask 589312   ;;  %s340_s1 = sshll.u32 %s451_s0, 4  ;;  %s341_s1 = int_to_ptr.vmem [resolvable:$true] %s340_s1 }
  0x11   :  { %v97_v58 = vsel %vm60_vm0, %v56_v51, 0.0  ;;  %v100_v60 = vsel %vm60_vm0, %v57_v53, 0.0  ;;  %v59_v61 = vmul.f32 %v43_v57, %v27_v56  ;;  %vm288_vm9 = vcmask 654912   ;;  %s429_s17 = scalar_lea.vmem %s341_s1, 16  ;;  %s433_s18 = scalar_lea.vmem %s341_s1, 32 }
  0x12   :  { %80 = vadd.xlane.f32.xlu0 %v79_v34  ;;  %83 = vadd.xlane.f32.xlu1 %v82_v36  ;;  %v103_v62 = vsel %vm60_vm0, %v58_v59, 0.0  ;;  %v579_v34 = vand.u32 127, %v221_v25  ;;  %vm295_vm10 = vcmask 720512   ;;  %vm302_vm11 = vcmask 786112   ;;  %p430_p0 = scmp.ne.s32.totalorder %s341_s1, %s429_s17  ;;  %p434_p1 = scmp.lt.s32.totalorder %s341_s1, %s341_s1 }
  0x13   :  { %v106_v63 = vsel %vm60_vm0, %v59_v61, 0.0  ;;  %vm309_vm12 = vcmask 851712   ;;  %vm316_vm13 = vcmask 917312   ;;  %vm323_vm14 = vcmask 982912   ;;  %p435_p2 = scmp.lt.s32.totalorder %s433_s18, %s429_s17 }
  0x14   :  { %v227_v47 = vadd.s32 4294967288, %v579_v34  ;;  %v241_v51 = vadd.s32 4294967272, %v579_v34  ;;  %v248_v55 = vadd.s32 4294967264, %v579_v34  ;;  %v225_v57 = vsub.s32 %v579_v34, %v581_v43 }
  0x15   :  { %v276_v25 = vadd.s32 4294967232, %v579_v34  ;;  %vm330_vm15 = vcmask 1048512   ;;  %p436_p3 = por %p435_p2, %p434_p1 }
  0x16   :  { %86 = vadd.xlane.f32.xlu0 %v85_v42  ;;  %89 = vadd.xlane.f32.xlu1 %v88_v44  ;;  %v234_v44 = vadd.s32 4294967280, %v579_v34  ;;  %v244_v61 = vsub.s32 %v241_v51, %v581_v43 }
  0x17   :  { %p437_p4 = pnand %p436_p3, %p430_p0 }
  0x1a   :  { %92 = vadd.xlane.f32.xlu0 %v91_v50  ;;  %95 = vadd.xlane.f32.xlu1 %v94_v52 }
  0x1e   :  { %98 = vadd.xlane.f32.xlu0 %v97_v58  ;;  %101 = vadd.xlane.f32.xlu1 %v100_v60  ;;  %v230_v58 = vsub.s32 %v227_v47, %v581_v43  ;;  %v237_v60 = vsub.s32 %v234_v44, %v581_v43 }
  0x22   :  { %104 = vadd.xlane.f32.xlu0 %v103_v62  ;;  %107 = vadd.xlane.f32.xlu1 %v106_v63 }
  0x8f   :  { %v63_v0 = vpop.xlane.xlu0 %62  ;;  %v69_v2 = vpop.xlane.xlu1 %68 }
  0x90   :  { %v348_v1 = vmul.f32 -1.442695, %v63_v0  ;;  %v350_v3 = vmul.f32 -1.442695, %v69_v2  ;;  %v255_v2 = vadd.s32 4294967256, %v579_v34 }
  0x92   :  { %365 = vpow2.f32 %v348_v1  ;;  %v251_v1 = vsub.s32 %v248_v55, %v581_v43 }
  0x93   :  { %367 = vpow2.f32 %v350_v3  ;;  %v66_v4 = vpop.xlane.xlu0 %65  ;;  %v72_v6 = vpop.xlane.xlu1 %71 }
  0x94   :  { %v349_v5 = vmul.f32 -1.442695, %v66_v4  ;;  %v351_v7 = vmul.f32 -1.442695, %v72_v6 }
  0x96   :  { %369 = vpow2.f32 %v349_v5 }
  0x97   :  { %371 = vpow2.f32 %v351_v7  ;;  %v75_v8 = vpop.xlane.xlu0 %74  ;;  %v78_v10 = vpop.xlane.xlu1 %77  ;;  %v262_v7 = vadd.s32 4294967248, %v579_v34 }
  0x98   :  { %v352_v9 = vmul.f32 -1.442695, %v75_v8  ;;  %v353_v11 = vmul.f32 -1.442695, %v78_v10 }
  0x9a   :  { %373 = vpow2.f32 %v352_v9 }
  0x9b   :  { %375 = vpow2.f32 %v353_v11  ;;  %v81_v12 = vpop.xlane.xlu0 %80  ;;  %v84_v14 = vpop.xlane.xlu1 %83 }
  0x9c   :  { %v354_v13 = vmul.f32 -1.442695, %v81_v12  ;;  %v355_v15 = vmul.f32 -1.442695, %v84_v14 }
  0x9e   :  { %377 = vpow2.f32 %v354_v13 }
  0x9f   :  { %v366_v16 = vpop.eup %365  ;;  %379 = vpow2.f32 %v355_v15  ;;  %v87_v17 = vpop.xlane.xlu0 %86 }
  0xa0   :  { %v368_v18 = vpop.eup %367  ;;  %v157_v19 = vadd.f32 1.0, %v366_v16  ;;  %v356_v20 = vmul.f32 -1.442695, %v87_v17  ;;  %v90_v21 = vpop.xlane.xlu1 %89  ;;  %v258_v16 = vsub.s32 %v255_v2, %v581_v43  ;;  %v269_v17 = vadd.s32 4294967240, %v579_v34 }
  0xa1   :  { %v159_v22 = vadd.f32 1.0, %v368_v18  ;;  %v357_v23 = vmul.f32 -1.442695, %v90_v21  ;;  %v265_v21 = vsub.s32 %v262_v7, %v581_v43  ;;  %v325_v2 = vadd.s32 4294967176, %v579_v34 }
  0xa2   :  { %381 = vrcp.f32 %v157_v19 }
  0xa3   :  { %v370_v24 = vpop.eup %369  ;;  %383 = vrcp.f32 %v159_v22  ;;  %v93_v26 = vpop.xlane.xlu0 %92 }
  0xa4   :  { %v372_v27 = vpop.eup %371  ;;  %v158_v28 = vadd.f32 1.0, %v370_v24  ;;  %385 = vpow2.f32 %v356_v20  ;;  %v358_v29 = vmul.f32 -1.442695, %v93_v26  ;;  %v96_v30 = vpop.xlane.xlu1 %95  ;;  %v283_v26 = vadd.s32 4294967224, %v579_v34 }
  0xa5   :  { %v160_v31 = vadd.f32 1.0, %v372_v27  ;;  %387 = vpow2.f32 %v357_v23  ;;  %v359_v32 = vmul.f32 -1.442695, %v96_v30  ;;  %v272_v30 = vsub.s32 %v269_v17, %v581_v43 }
  0xa6   :  { %389 = vrcp.f32 %v158_v28 }
  0xa7   :  { %v374_v33 = vpop.eup %373  ;;  %391 = vrcp.f32 %v160_v31  ;;  %v99_v35 = vpop.xlane.xlu0 %98 }
  0xa8   :  { %v376_v36 = vpop.eup %375  ;;  %v161_v37 = vadd.f32 1.0, %v374_v33  ;;  %393 = vpow2.f32 %v358_v29  ;;  %v360_v38 = vmul.f32 -1.442695, %v99_v35  ;;  %v102_v39 = vpop.xlane.xlu1 %101 }
  0xa9   :  { %v162_v40 = vadd.f32 1.0, %v376_v36  ;;  %395 = vpow2.f32 %v359_v32  ;;  %v361_v41 = vmul.f32 -1.442695, %v102_v39  ;;  %v286_v39 = vsub.s32 %v283_v26, %v581_v43 }
  0xaa   :  { %397 = vrcp.f32 %v161_v37 }
  0xab   :  { %v378_v42 = vpop.eup %377  ;;  %399 = vrcp.f32 %v162_v40  ;;  %v105_v45 = vpop.xlane.xlu0 %104 }
  0xac   :  { %v380_v46 = vpop.eup %379  ;;  %v163_v48 = vadd.f32 1.0, %v378_v42  ;;  %401 = vpow2.f32 %v360_v38  ;;  %v362_v49 = vmul.f32 -1.442695, %v105_v45  ;;  %v108_v50 = vpop.xlane.xlu1 %107  ;;  %v279_v38 = vsub.s32 %v276_v25, %v581_v43 }
  0xad   :  { %v164_v52 = vadd.f32 1.0, %v380_v46  ;;  %403 = vpow2.f32 %v361_v41  ;;  %v363_v53 = vmul.f32 -1.442695, %v108_v50  ;;  %v290_v41 = vadd.s32 4294967216, %v579_v34 }
  0xae   :  { %405 = vrcp.f32 %v163_v48  ;;  %v297_v46 = vadd.s32 4294967208, %v579_v34 }
  0xaf   :  { %v382_v54 = vpop.eup %381  ;;  %407 = vrcp.f32 %v164_v52  ;;  %v293_v51 = vsub.s32 %v290_v41, %v581_v43  ;;  %v304_v52 = vadd.s32 4294967200, %v579_v34 }
  0xb0   :  { %v384_v56 = vpop.eup %383  ;;  %409 = vpow2.f32 %v362_v49  ;;  %v226_v5 = vrot.slane %v382_v54, %v225_v57  ;;  %v300_v55 = vsub.s32 %v297_v46, %v581_v43 }
  0xb1   :  { %v386_v59 = vpop.eup %385  ;;  %411 = vpow2.f32 %v363_v53  ;;  %v238_v9 = vrot.slane %v384_v56, %v237_v60  ;;  %v311_v56 = vadd.s32 4294967192, %v579_v34 }
  0xb2   :  { %v388_v62 = vpop.eup %387  ;;  %v165_v63 = vadd.f32 1.0, %v386_v59 }
  0xb3   :  { %v390_v0 = vpop.eup %389  ;;  %v166_v3 = vadd.f32 1.0, %v388_v62  ;;  %v318_v62 = vadd.s32 4294967184, %v579_v34 }
  0xb4   :  { %v392_v4 = vpop.eup %391  ;;  %v231_v6 = vrot.slane %v390_v0, %v230_v58  ;;  %413 = vrcp.f32 %v165_v63 }
  0xb5   :  { %v394_v8 = vpop.eup %393  ;;  %v245_v10 = vrot.slane %v392_v4, %v244_v61  ;;  %415 = vrcp.f32 %v166_v3  ;;  %v307_v61 = vsub.s32 %v304_v52, %v581_v43  ;;  %v321_v7 = vsub.s32 %v318_v62, %v581_v43 }
  0xb6   :  { %v396_v11 = vpop.eup %395  ;;  %v233_v12 = vsel %vm232_vm1, %v231_v6, %v226_v5  ;;  %v167_v13 = vadd.f32 1.0, %v394_v8 }
  0xb7   :  { %v398_v14 = vpop.eup %397  ;;  %v240_v15 = vsel %vm239_vm2, %v238_v9, %v233_v12  ;;  %v168_v18 = vadd.f32 1.0, %v396_v11 }
  0xb8   :  { %v400_v19 = vpop.eup %399  ;;  %v252_v20 = vrot.slane %v398_v14, %v251_v1  ;;  %417 = vrcp.f32 %v167_v13  ;;  %v247_v23 = vsel %vm246_vm3, %v245_v10, %v240_v15  ;;  %v314_v1 = vsub.s32 %v311_v56, %v581_v43 }
  0xb9   :  { %v402_v22 = vpop.eup %401  ;;  %419 = vrcp.f32 %v168_v18  ;;  %v259_v29 = vrot.slane %v400_v19, %v258_v16  ;;  %v328_v10 = vsub.s32 %v325_v2, %v581_v43 }
  0xba   :  { %v404_v24 = vpop.eup %403  ;;  %v169_v27 = vadd.f32 1.0, %v402_v22  ;;  %v254_v33 = vsel %vm253_vm4, %v252_v20, %v247_v23 }
  0xbb   :  { %v406_v28 = vpop.eup %405  ;;  %v170_v31 = vadd.f32 1.0, %v404_v24  ;;  %v261_v42 = vsel %vm260_vm5, %v259_v29, %v254_v33 }
  0xbc   :  { %v408_v32 = vpop.eup %407  ;;  %v266_v35 = vrot.slane %v406_v28, %v265_v21  ;;  %421 = vrcp.f32 %v169_v27 }
  0xbd   :  { %v410_v36 = vpop.eup %409  ;;  %423 = vrcp.f32 %v170_v31  ;;  %v273_v44 = vrot.slane %v408_v32, %v272_v30 }
  0xbe   :  { %v412_v37 = vpop.eup %411  ;;  %v171_v40 = vadd.f32 1.0, %v410_v36  ;;  %v268_v47 = vsel %vm267_vm6, %v266_v35, %v261_v42 }
  0xbf   :  { %v172_v45 = vadd.f32 1.0, %v412_v37  ;;  %v275_v54 = vsel %vm274_vm7, %v273_v44, %v268_v47 }
  0xc0   :  { %425 = vrcp.f32 %v171_v40 }
  0xc1   :  { %v414_v48 = vpop.eup %413  ;;  %427 = vrcp.f32 %v172_v45 }
  0xc2   :  { %v416_v49 = vpop.eup %415  ;;  %v280_v50 = vrot.slane %v414_v48, %v279_v38 }
  0xc3   :  { %v287_v53 = vrot.slane %v416_v49, %v286_v39 }
  0xc4   :  { %v282_v57 = vsel %vm281_vm8, %v280_v50, %v275_v54 }
  0xc5   :  { %v418_v58 = vpop.eup %417  ;;  %v289_v63 = vsel %vm288_vm9, %v287_v53, %v282_v57 }
  0xc6   :  { %v420_v59 = vpop.eup %419  ;;  %v294_v60 = vrot.slane %v418_v58, %v293_v51 }
  0xc7   :  { %v301_v0 = vrot.slane %v420_v59, %v300_v55 }
  0xc8   :  { %v296_v3 = vsel %vm295_vm10, %v294_v60, %v289_v63 }
  0xc9   :  { %v422_v4 = vpop.eup %421  ;;  %v303_v8 = vsel %vm302_vm11, %v301_v0, %v296_v3 }
  0xca   :  { %v424_v5 = vpop.eup %423  ;;  %v308_v6 = vrot.slane %v422_v4, %v307_v61 }
  0xcb   :  { %v315_v9 = vrot.slane %v424_v5, %v314_v1 }
  0xcc   :  { %v310_v11 = vsel %vm309_vm12, %v308_v6, %v303_v8 }
  0xcd   :  { %v426_v12 = vpop.eup %425  ;;  %v317_v14 = vsel %vm316_vm13, %v315_v9, %v310_v11 }
  0xce   :  { %v428_v13 = vpop.eup %427  ;;  %v322_v34 = vrot.slane %v426_v12, %v321_v7 }
  0xcf   :  { %v329_v15 = vrot.slane %v428_v13, %v328_v10 }
  0xd0   :  { %v324_v16 = vsel %vm323_vm14, %v322_v34, %v317_v14 }
  0xd1   :  { %v331_v17 = vsel %vm330_vm15, %v329_v15, %v324_v16 }
  0xd2   :  { %333 = vst [vmem:[#allocation2] sm:$0x1] %v331_v17 }
  0xd3   :  { %440 = shalt.err (!%p437_p4)
}
  0xd4   :  { %343 = dma.vmem_to_hbm [thread:$0]  %s341_s1, 16, %s622_s2, [#allocation3]  }
  0xd5   :  { %449 = dma.done.wait [#allocation3], 16  }
  0xd6   :  { %450 = vsyncadd [#allocation3], 4294967280 }
  0xd7   :  { %347 = vsyncpa [#allocation3], 1 }

</bundles_post_ra>
